<compile_context>
chip_gen: v5e
topology: v5e:2x2
jax: 0.10.0
libtpu: 0.0.40
codegen_flags: <defaults>
</compile_context>

<pallas_src>
import functools

import jax
import jax.numpy as jnp
from jax.experimental import pallas as pl
from jax.experimental.pallas import tpu as pltpu

_LANE = 128


def _bert_cls_head_kernel(x_ref, wp_ref, bp_ref, wc_ref, bc_ref, lab_ref,
                          out_ref, *, num_labels, loss_col):
    """One batch tile: pooler dense+tanh, classifier, per-example CE loss.

    x_ref:   [tile_b, H]        CLS-token hidden states for this tile
    wp_ref:  [H, H]       bf16  pooler weight, stored [in, out]
    bp_ref:  [1, H]       f32   pooler bias
    wc_ref:  [H, L_pad]   bf16  classifier weight, zero-padded to lane width
    bc_ref:  [1, L_pad]   f32   classifier bias, zero-padded
    lab_ref: [tile_b, 1]  i32   labels (-100 = ignored)
    out_ref: [tile_b, L_pad] f32
             columns [0, num_labels) = logits, column `loss_col` = per-ex CE.
    """
    # BertPooler.dense + Tanh: bf16 operands -> f32 MXU accumulation, f32 epilogue
    # (v5e has no bf16 VPU/EUP).  astype is a no-op when x already arrives bf16.
    x = x_ref[...].astype(jnp.bfloat16)
    pooled = jnp.tanh(
        jnp.dot(x, wp_ref[...], preferred_element_type=jnp.float32) + bp_ref[...]
    )

    # Classifier head; padded columns are exactly zero (zero weight, zero bias).
    logits = (
        jnp.dot(pooled.astype(jnp.bfloat16), wc_ref[...],
                preferred_element_type=jnp.float32)
        + bc_ref[...]
    )

    tb, l_pad = logits.shape
    cols = jax.lax.broadcasted_iota(jnp.int32, (tb, l_pad), 1)          # [tb,Lp]
    valid_col = cols < num_labels

    # Per-example cross entropy over the first `num_labels` columns only:
    #   lse(logits[:, :L]) - logits[label]       (all f32).
    masked = jnp.where(valid_col, logits, -jnp.inf)
    m = jnp.max(masked, axis=-1, keepdims=True)                               # [tb,1]
    lse = m + jnp.log(jnp.sum(jnp.exp(masked - m), axis=-1, keepdims=True))   # [tb,1]
    onehot = (cols == lab_ref[...]).astype(jnp.float32)                       # [tb,Lp]
    target = jnp.sum(onehot * logits, axis=-1, keepdims=True)                 # [tb,1]
    per_ex = lse - target                                                     # [tb,1]

    # Single lane-dense store: logits (zeros in pad columns) with the
    # per-example loss folded into one spare column.
    out = jnp.where(valid_col, logits, 0.0)
    out = jnp.where(cols == loss_col, per_ex, out)
    out_ref[...] = out


def _num_tensorcores():
    """Best-effort TensorCore count of device 0 (2 on v7x-style chips, else 1)."""
    try:
        n = getattr(jax.devices()[0], "num_cores", 1)
        return max(1, int(n)) if n else 1
    except Exception:
        return 1


def _pick_tile_b(batch, cap=1024, min_tiles=1):
    """Largest divisor of `batch` <= cap (and <= batch // min_tiles) that is a
    multiple of 128 (MXU M-dim), else 16 (bf16 sublanes), else 8; fall back to
    the full batch (a block equal to the full array dim is always legal)."""
    cap = max(1, min(cap, batch // max(min_tiles, 1)))
    for step in (128, 16, 8):
        cands = [t for t in range(step, min(batch, cap) + 1, step)
                 if batch % t == 0]
        if cands:
            return max(cands)
    return batch


def bert_cls_head(hidden_states, w_pool, b_pool, w_cls, b_cls, labels,
                  *, tile_b=None):
    """hidden_states: [B,S,H] (ideally bf16 from the encoder); w_pool: [H,H]
    ([in,out]); b_pool: [H]; w_cls: [H,L] ([in,out]); b_cls: [L]; labels: [B]
    int (-100 = ignored, like torch CrossEntropyLoss). Returns (loss, logits)."""
    B, S, H = hidden_states.shape
    L = w_cls.shape[1]

    # Lane-padded classifier width with at least one spare column for the loss.
    L_pad = pl.cdiv(L + 1, _LANE) * _LANE
    loss_col = L_pad - 1

    if tile_b is None:
        # >=2 grid steps when 2 TensorCores are available (v7x); otherwise the
        # largest tile that divides B, to amortize per-step pipeline overhead.
        tile_b = _pick_tile_b(B, cap=1024, min_tiles=_num_tensorcores())
    assert B % tile_b == 0, (B, tile_b)
    n_tiles = B // tile_b

    # CLS-slice fusion: view hidden_states as [B, S*H]; the CLS token of every
    # row is columns [0, H). Requires H % 128 == 0 (true for BERT hidden sizes)
    # so the x block stays lane-aligned; otherwise fall back to a wrapper slice.
    # The encoder dtype is kept as-is (no full-tensor wrapper cast).
    if H % _LANE == 0 or S == 1:
        x_in = hidden_states.reshape(B, S * H)      # zero-copy view, CLS = cols [0,H)
    else:
        x_in = hidden_states[:, 0, :]               # [B, H] fallback

    wp = w_pool.astype(jnp.bfloat16)
    bp = jnp.reshape(b_pool, (1, H)).astype(jnp.float32)
    wc = jnp.pad(w_cls.astype(jnp.bfloat16), ((0, 0), (0, L_pad - L)))
    bc = jnp.pad(jnp.reshape(b_cls, (1, L)).astype(jnp.float32),
                 ((0, 0), (0, L_pad - L)))
    lab = labels.reshape(B, 1).astype(jnp.int32)

    kernel = functools.partial(_bert_cls_head_kernel,
                               num_labels=L, loss_col=loss_col)

    # Constant-index operands never change across grid steps -> single buffer.
    const = dict(pipeline_mode=pl.Buffered(1))

    out = pl.pallas_call(
        kernel,
        out_shape=jax.ShapeDtypeStruct((B, L_pad), jnp.float32),
        grid=(n_tiles,),
        in_specs=[
            # x: block-column 0 of width H == the CLS rows of this batch tile.
            pl.BlockSpec((tile_b, H), lambda i: (i, 0)),
            pl.BlockSpec((H, H), lambda i: (0, 0), **const),      # pooler W
            pl.BlockSpec((1, H), lambda i: (0, 0), **const),      # pooler b
            pl.BlockSpec((H, L_pad), lambda i: (0, 0), **const),  # classifier W
            pl.BlockSpec((1, L_pad), lambda i: (0, 0), **const),  # classifier b
            pl.BlockSpec((tile_b, 1), lambda i: (i, 0)),          # labels
        ],
        out_specs=pl.BlockSpec((tile_b, L_pad), lambda i: (i, 0)),
        compiler_params=pltpu.CompilerParams(
            dimension_semantics=("parallel",),        # batch tiles are independent
            vmem_limit_bytes=48 * 1024 * 1024,        # raise scoped default; fits v7x
        ),
    )(x_in, wp, bp, wc, bc, lab)

    logits = out[:, :L]
    per_example = out[:, loss_col]

    # nn.CrossEntropyLoss(reduction='mean', ignore_index=-100) over B scalars.
    # No clamp: all-ignored batch gives NaN, matching torch semantics.
    valid = (labels != -100).astype(jnp.float32)
    loss = jnp.sum(per_example * valid) / jnp.sum(valid)
    return loss, logits


if __name__ == "__main__":
    B, S, H, L = 32, 8, 128, 4  # batch, seq, hidden_size (BERT-tiny), num_labels

    key = jax.random.PRNGKey(0)
    k_hid, k_wp, k_bp, k_wc, k_lab = jax.random.split(key, 5)

    # Synthetic encoder output (stand-in for AutoModel last_hidden_states),
    # kept bf16 end-to-end (the kernel's only batch-scaling HBM read).
    hidden_states = jax.random.normal(k_hid, (B, S, H), dtype=jnp.float32
                                      ).astype(jnp.bfloat16)

    # BertPooler.dense params (synthetic); classifier per _init_weights
    # (weight ~ N(0, 0.02), bias = 0).
    w_pool = jax.random.normal(k_wp, (H, H), dtype=jnp.float32) * 0.02
    b_pool = jax.random.normal(k_bp, (H,), dtype=jnp.float32) * 0.02
    w_cls = jax.random.normal(k_wc, (H, L), dtype=jnp.float32) * 0.02
    b_cls = jnp.zeros((L,), dtype=jnp.float32)

    labels = jax.random.randint(k_lab, (B,), 0, L, dtype=jnp.int32)

    loss, logits = bert_cls_head(hidden_states, w_pool, b_pool, w_cls, b_cls,
                                 labels)
    jax.block_until_ready((loss, logits))

    # Pure-JAX reference of the head, same bf16-operand / f32-accumulation recipe.
    cls_b = hidden_states[:, 0, :]                                   # bf16
    pooled_ref = jnp.tanh(
        jnp.dot(cls_b, w_pool.astype(jnp.bfloat16),
                preferred_element_type=jnp.float32) + b_pool[None, :]
    )
    logits_ref = jnp.dot(pooled_ref.astype(jnp.bfloat16),
                         w_cls.astype(jnp.bfloat16),
                         preferred_element_type=jnp.float32) + b_cls[None, :]
    m_ref = jnp.max(logits_ref, axis=-1, keepdims=True)
    lse_ref = (m_ref + jnp.log(jnp.sum(jnp.exp(logits_ref - m_ref),
                                       axis=-1, keepdims=True)))[:, 0]
    per_ref = lse_ref - logits_ref[jnp.arange(B), labels]
    loss_ref = jnp.mean(per_ref)  # all labels valid in this demo

    assert jnp.allclose(logits, logits_ref, atol=1e-2), "logits mismatch"
    assert jnp.allclose(loss, loss_ref, atol=1e-2), "loss mismatch"

    print("KERNEL_OK")
</pallas_src>

<mosaic_0001>
module attributes {stable_mosaic.version = 11 : i64} {
  func.func @_bert_cls_head_kernel(%arg0: i32, %arg1: memref<32x128xbf16, #tpu.memory_space<vmem>>, %arg2: memref<128x128xbf16, #tpu.memory_space<vmem>>, %arg3: memref<1x128xf32, #tpu.memory_space<vmem>>, %arg4: memref<128x128xbf16, #tpu.memory_space<vmem>>, %arg5: memref<1x128xf32, #tpu.memory_space<vmem>>, %arg6: memref<32x1xi32, #tpu.memory_space<vmem>>, %arg7: memref<32x128xf32, #tpu.memory_space<vmem>>) attributes {dimension_semantics = [#tpu.dimension_semantics<parallel>], iteration_bounds = array<i64: 1>, scalar_prefetch = 0 : i64, scratch_operands = 0 : i64, tpu.core_type = #tpu.core_type<tc>, window_params = [{transform_indices = @transform_0, window_bounds = array<i64: 32, 128>}, {pipeline_mode = #tpu.pipeline_mode<synchronous>, transform_indices = @transform_1, window_bounds = array<i64: 128, 128>}, {pipeline_mode = #tpu.pipeline_mode<synchronous>, transform_indices = @transform_2, window_bounds = array<i64: 1, 128>}, {pipeline_mode = #tpu.pipeline_mode<synchronous>, transform_indices = @transform_3, window_bounds = array<i64: 128, 128>}, {pipeline_mode = #tpu.pipeline_mode<synchronous>, transform_indices = @transform_4, window_bounds = array<i64: 1, 128>}, {transform_indices = @transform_5, window_bounds = array<i64: 32, 1>}, {transform_indices = @transform_6, window_bounds = array<i64: 32, 128>}]} {
    %c0 = arith.constant 0 : index
    %c0_0 = arith.constant 0 : index
    %0 = vector.load %arg1[%c0, %c0_0] : memref<32x128xbf16, #tpu.memory_space<vmem>>, vector<32x128xbf16>
    %c0_1 = arith.constant 0 : index
    %c0_2 = arith.constant 0 : index
    %1 = vector.load %arg2[%c0_1, %c0_2] : memref<128x128xbf16, #tpu.memory_space<vmem>>, vector<128x128xbf16>
    %cst = arith.constant dense<0.000000e+00> : vector<32x128xf32>
    %2 = tpu.matmul %0, %1, %cst {dimension_numbers = #tpu.dot_dimension_numbers<[1], [0], [0], [1], [0, 0, 1, 1], [], []>} : vector<32x128xbf16>, vector<128x128xbf16>, vector<32x128xf32> -> vector<32x128xf32>
    %c0_3 = arith.constant 0 : index
    %c0_4 = arith.constant 0 : index
    %3 = vector.load %arg3[%c0_3, %c0_4] : memref<1x128xf32, #tpu.memory_space<vmem>>, vector<1x128xf32>
    %4 = vector.broadcast %3 : vector<1x128xf32> to vector<32x128xf32>
    %5 = arith.addf %2, %4 : vector<32x128xf32>
    %6 = math.tanh %5 : vector<32x128xf32>
    %7 = arith.truncf %6 : vector<32x128xf32> to vector<32x128xbf16>
    %c0_5 = arith.constant 0 : index
    %c0_6 = arith.constant 0 : index
    %8 = vector.load %arg4[%c0_5, %c0_6] : memref<128x128xbf16, #tpu.memory_space<vmem>>, vector<128x128xbf16>
    %cst_7 = arith.constant dense<0.000000e+00> : vector<32x128xf32>
    %9 = tpu.matmul %7, %8, %cst_7 {dimension_numbers = #tpu.dot_dimension_numbers<[1], [0], [0], [1], [0, 0, 1, 1], [], []>} : vector<32x128xbf16>, vector<128x128xbf16>, vector<32x128xf32> -> vector<32x128xf32>
    %c0_8 = arith.constant 0 : index
    %c0_9 = arith.constant 0 : index
    %10 = vector.load %arg5[%c0_8, %c0_9] : memref<1x128xf32, #tpu.memory_space<vmem>>, vector<1x128xf32>
    %11 = vector.broadcast %10 : vector<1x128xf32> to vector<32x128xf32>
    %12 = arith.addf %9, %11 : vector<32x128xf32>
    %13 = tpu.iota {dimensions = array<i32: 1>} : vector<32x128xi32>
    %c4_i32 = arith.constant 4 : i32
    %14 = vector.broadcast %c4_i32 : i32 to vector<32x128xi32>
    %15 = arith.cmpi slt, %13, %14 : vector<32x128xi32>
    %cst_10 = arith.constant 0xFF800000 : f32
    %16 = vector.broadcast %cst_10 : f32 to vector<32x128xf32>
    %17 = arith.select %15, %12, %16 : vector<32x128xi1>, vector<32x128xf32>
    %cst_11 = arith.constant dense<0xFF800000> : vector<32xf32>
    %18 = vector.multi_reduction <maximumf>, %17, %cst_11 [1] : vector<32x128xf32> to vector<32xf32>
    %19 = vector.shape_cast %18 : vector<32xf32> to vector<32x1xf32>
    %20 = vector.broadcast %19 : vector<32x1xf32> to vector<32x128xf32>
    %21 = arith.subf %17, %20 : vector<32x128xf32>
    %22 = math.exp %21 : vector<32x128xf32>
    %cst_12 = arith.constant dense<0.000000e+00> : vector<32xf32>
    %23 = vector.multi_reduction <add>, %22, %cst_12 [1] : vector<32x128xf32> to vector<32xf32>
    %24 = vector.shape_cast %23 : vector<32xf32> to vector<32x1xf32>
    %25 = math.log %24 : vector<32x1xf32>
    %26 = arith.addf %19, %25 : vector<32x1xf32>
    %c0_13 = arith.constant 0 : index
    %c0_14 = arith.constant 0 : index
    %27 = vector.load %arg6[%c0_13, %c0_14] : memref<32x1xi32, #tpu.memory_space<vmem>>, vector<32x1xi32>
    %28 = vector.broadcast %27 : vector<32x1xi32> to vector<32x128xi32>
    %29 = arith.cmpi eq, %13, %28 : vector<32x128xi32>
    %30 = arith.extui %29 : vector<32x128xi1> to vector<32x128xi32>
    %31 = arith.sitofp %30 : vector<32x128xi32> to vector<32x128xf32>
    %32 = arith.mulf %31, %12 : vector<32x128xf32>
    %cst_15 = arith.constant dense<0.000000e+00> : vector<32xf32>
    %33 = vector.multi_reduction <add>, %32, %cst_15 [1] : vector<32x128xf32> to vector<32xf32>
    %34 = vector.shape_cast %33 : vector<32xf32> to vector<32x1xf32>
    %35 = arith.subf %26, %34 : vector<32x1xf32>
    %cst_16 = arith.constant 0.000000e+00 : f32
    %36 = vector.broadcast %cst_16 : f32 to vector<32x128xf32>
    %37 = arith.select %15, %12, %36 : vector<32x128xi1>, vector<32x128xf32>
    %c127_i32 = arith.constant 127 : i32
    %38 = vector.broadcast %c127_i32 : i32 to vector<32x128xi32>
    %39 = arith.cmpi eq, %13, %38 : vector<32x128xi32>
    %40 = vector.shape_cast %35 : vector<32x1xf32> to vector<32x1xf32>
    %41 = vector.broadcast %40 : vector<32x1xf32> to vector<32x128xf32>
    %42 = arith.select %39, %41, %37 : vector<32x128xi1>, vector<32x128xf32>
    %c0_17 = arith.constant 0 : index
    %c0_18 = arith.constant 0 : index
    %43 = vector.load %arg7[%c0_17, %c0_18] : memref<32x128xf32, #tpu.memory_space<vmem>>, vector<32x128xf32>
    tpu.vector_store %arg7[%c0_17, %c0_18], %42 {strides = array<i32>} : memref<32x128xf32, #tpu.memory_space<vmem>>, vector<32x128xf32>,
    return
  }
  func.func @transform_0(%arg0: i32) -> (i32, i32) {
    %c0_i32 = arith.constant 0 : i32
    %c0_i32_0 = arith.constant 0 : i32
    return %arg0, %c0_i32 : i32, i32
  }
  func.func @transform_1(%arg0: i32) -> (i32, i32) {
    %c0_i32 = arith.constant 0 : i32
    %c0_i32_0 = arith.constant 0 : i32
    %c0_i32_1 = arith.constant 0 : i32
    return %c0_i32, %c0_i32_0 : i32, i32
  }
  func.func @transform_2(%arg0: i32) -> (i32, i32) {
    %c0_i32 = arith.constant 0 : i32
    %c0_i32_0 = arith.constant 0 : i32
    %c0_i32_1 = arith.constant 0 : i32
    return %c0_i32, %c0_i32_0 : i32, i32
  }
  func.func @transform_3(%arg0: i32) -> (i32, i32) {
    %c0_i32 = arith.constant 0 : i32
    %c0_i32_0 = arith.constant 0 : i32
    %c0_i32_1 = arith.constant 0 : i32
    return %c0_i32, %c0_i32_0 : i32, i32
  }
  func.func @transform_4(%arg0: i32) -> (i32, i32) {
    %c0_i32 = arith.constant 0 : i32
    %c0_i32_0 = arith.constant 0 : i32
    %c0_i32_1 = arith.constant 0 : i32
    return %c0_i32, %c0_i32_0 : i32, i32
  }
  func.func @transform_5(%arg0: i32) -> (i32, i32) {
    %c0_i32 = arith.constant 0 : i32
    %c0_i32_0 = arith.constant 0 : i32
    return %arg0, %c0_i32 : i32, i32
  }
  func.func @transform_6(%arg0: i32) -> (i32, i32) {
    %c0_i32 = arith.constant 0 : i32
    %c0_i32_0 = arith.constant 0 : i32
    return %arg0, %c0_i32 : i32, i32
  }
}

</mosaic_0001>

<bundles_post_ra>
// kernel: tpu_custom_call.1
= control target key start
LH: loop header
LB: loop body
LE: loop exit
PB: predicated region body
PF: predicated region fallthrough
CT: control target
= control target key end

     0   :  { %11 = vsyncpa [#allocation3], 0  ;;  %s767_s0 = inlined_call_operand.hbm [shape: bf16[32,1024], index: 0, kind: input, shape index: {}]   ;;  %s768_s1 = inlined_call_operand.hbm [shape: bf16[128,128], index: 1, kind: input, shape index: {}]   ;;  %s769_s2 = inlined_call_operand.vmem [shape: f32[1,128], index: 2, kind: input, shape index: {}]   ;;  %s770_s3 = inlined_call_operand.hbm [shape: bf16[128,128], index: 3, kind: input, shape index: {}]   ;;  %s771_s4 = inlined_call_operand.vmem [shape: f32[1,128], index: 4, kind: input, shape index: {}]   ;;  %s772_s5 = inlined_call_operand.vmem [shape: s32[32,1], index: 5, kind: input, shape index: {}]   ;;  %s773_s6 = inlined_call_operand.hbm [shape: f32[32,128], index: 6, kind: output, shape index: {}]  }
   0x1   :  { %12 = vsyncpa [#allocation6], 0 }
   0x2   :  { %13 = vsyncpa [#allocation4], 0  ;;  %s31_s23 = sshll.u32 %s768_s1, 4  ;;  %s643_s24 = smov [#allocation5]   ;;  %s32_s23 = int_to_ptr.hbm [resolvable:$true] %s31_s23 }
   0x3   :  { %s33_s25 = sshll.u32 %s643_s24, 4  ;;  %s18_s28 = sshll.u32 %s767_s0, 4  ;;  %s34_s25 = int_to_ptr.vmem [resolvable:$true] %s33_s25  ;;  %s19_s28 = int_to_ptr.hbm [resolvable:$true] %s18_s28 }
   0x4   :  { %s644_s29 = smov 64   ;;  %s645_s30 = smov 4  }
   0x5   :  { %39 = dma.hbm_to_vmem [thread:$0]  %s32_s23, 1024, %s34_s25, [#allocation6], %s644_s29, %s644_s29, %s645_s30  }
   0x6   :  { %s646_s7 = smov [#allocation2]   ;;  %s46_s11 = sshll.u32 %s770_s3, 4  ;;  %s47_s11 = int_to_ptr.hbm [resolvable:$true] %s46_s11 }
   0x7   :  { %s20_s8 = sshll.u32 %s646_s7, 4  ;;  %s647_s1 = smov 512   ;;  %s21_s8 = int_to_ptr.vmem [resolvable:$true] %s20_s8 }
   0x8   :  { %26 = dma.hbm_to_vmem [thread:$0]  %s19_s28, 256, %s21_s8, [#allocation3], %s647_s1, %s644_s29, %s645_s30  }
   0x9   :  { %s648_s12 = smov [#allocation7]  }
   0xa   :  { %s48_s13 = sshll.u32 %s648_s12, 4  ;;  %s49_s13 = int_to_ptr.vmem [resolvable:$true] %s48_s13 }
   0xb   :  { %54 = dma.hbm_to_vmem [thread:$0]  %s47_s11, 1024, %s49_s13, [#allocation6], %s644_s29, %s644_s29, %s645_s30  }
   0xc   :  { %637 = dma.done.wait [#allocation3], 256  }
   0xd   :  { %638 = vsyncadd [#allocation3], 4294967040 }
   0xe   :  { %639 = dma.done.wait [#allocation6], 2048  }
   0xf   :  { %640 = vsyncadd [#allocation6], 4294965248  ;;  %v476_v0 = vld [vmem:[#allocation5 + $0x38] sm:$0xff]  ;;  %v475_v1 = vld [vmem:[#allocation5 + $0x30] sm:$0xff]  ;;  %v649_v19 = vmov 0   ;;  %v267_v36 = vlaneseq  ;;  %s377_s25 = sshll.u32 %s773_s6, 4  ;;  %s378_s25 = int_to_ptr.hbm [resolvable:$true] %s377_s25 }
  0x10   :  { %155 = vmatpush.bf16.msra.mxu0 %v476_v0  ;;  %485 = vmatpush.bf16.msra.mxu2 %v476_v0  ;;  %v484_v2 = vld [vmem:[#allocation7 + $0x38] sm:$0xff]  ;;  %v483_v3 = vld [vmem:[#allocation7 + $0x30] sm:$0xff]  ;;  %v474_v4 = vld [vmem:[#allocation5 + $0x28] sm:$0xff]  ;;  %s652_s6 = smov 128   ;;  %s653_s26 = smov 8  }
  0x11   :  { %248 = vmatpush.bf16.msra.mxu1 %v484_v2  ;;  %493 = vmatpush.bf16.msra.mxu3 %v484_v2  ;;  %v482_v5 = vld [vmem:[#allocation7 + $0x28] sm:$0xff]  ;;  %v473_v6 = vld [vmem:[#allocation5 + $0x20] sm:$0xff]  ;;  %v472_v7 = vld [vmem:[#allocation5 + $0x18] sm:$0xff]  ;;  %v707_v37 = vand.u32 127, %v267_v36 }
  0x12   :  { %v471_v8 = vld [vmem:[#allocation5 + $0x10] sm:$0xff]  ;;  %v470_v9 = vld [vmem:[#allocation5 + $0x8] sm:$0xff]  ;;  %v469_v10 = vld [vmem:[#allocation5] sm:$0xff]  ;;  %512 = vset.pattern.permute.xlu2 %v649_v19  ;;  %513 = vset.pattern.permute.xlu0 %v649_v19 }
  0x13   :  { %v467_v11 = vld [vmem:[#allocation2] sm:$0xff]  ;;  %v468_v12 = vld [vmem:[#allocation2 + $0x8] sm:$0xff]  ;;  %v481_v13 = vld [vmem:[#allocation7 + $0x20] sm:$0xff]  ;;  %514 = vset.pattern.permute.xlu1 %v649_v19  ;;  %vm269_vm0 = vcmp.lt.s32.totalorder %v707_v37, 4  ;;  %vm362_vm5 = vcmp.eq.s32.totalorder %v707_v37, 127 }
  0x14   :  { %156 = vmatpush.bf16.msra.mxu0 %v475_v1  ;;  %486 = vmatpush.bf16.msra.mxu2 %v475_v1  ;;  %v480_v14 = vld [vmem:[#allocation7 + $0x18] sm:$0xff]  ;;  %v479_v15 = vld [vmem:[#allocation7 + $0x10] sm:$0xff]  ;;  %v478_v16 = vld [vmem:[#allocation7 + $0x8] sm:$0xff]  ;;  %v650_v1 = vmov 0.0  }
  0x15   :  { %249 = vmatpush.bf16.msra.mxu1 %v483_v3  ;;  %494 = vmatpush.bf16.msra.mxu3 %v483_v3  ;;  %v477_v17 = vld [vmem:[#allocation7] sm:$0xff]  ;;  %v314_v18 = vld [vmem:[%s772_s5] sm:$0xff]  ;;  %v315_v21 = vld [vmem:[%s772_s5 + $0x8] sm:$0xff] }
  0x16   :  { %319 = vperm.xlu2 %512, %v314_v18   ;;  %v515_v22 = vld [vmem:[%s769_s2] ss:$0 sm:$0xff]  ;;  %v316_v53 = vld [vmem:[%s772_s5 + $0x10] sm:$0xff]  ;;  %v317_v54 = vld [vmem:[%s772_s5 + $0x18] sm:$0xff]  ;;  %s651_s5 = smov [#allocation8]  }
  0x17   :  { %v516_v38 = vld [vmem:[%s771_s4] ss:$0 sm:$0xff]  ;;  %s375_s22 = sshll.u32 %s651_s5, 4  ;;  %s376_s22 = int_to_ptr.vmem [resolvable:$true] %s375_s22 }
  0x18   :  { %157 = vmatpush.bf16.msra.mxu0 %v474_v4  ;;  %487 = vmatpush.bf16.msra.mxu2 %v474_v4 }
  0x19   :  { %250 = vmatpush.bf16.msra.mxu1 %v482_v5  ;;  %495 = vmatpush.bf16.msra.mxu3 %v482_v5 }
  0x1c   :  { %158 = vmatpush.bf16.msra.mxu0 %v473_v6  ;;  %488 = vmatpush.bf16.msra.mxu2 %v473_v6 }
  0x1d   :  { %251 = vmatpush.bf16.msra.mxu1 %v481_v13  ;;  %496 = vmatpush.bf16.msra.mxu3 %v481_v13 }
  0x1e   :  { %322 = vperm.xlu2 %512, %v315_v21  }
  0x20   :  { %159 = vmatpush.bf16.msra.mxu0 %v472_v7  ;;  %489 = vmatpush.bf16.msra.mxu2 %v472_v7 }
  0x21   :  { %252 = vmatpush.bf16.msra.mxu1 %v480_v14  ;;  %497 = vmatpush.bf16.msra.mxu3 %v480_v14 }
  0x24   :  { %160 = vmatpush.bf16.msra.mxu0 %v471_v8  ;;  %490 = vmatpush.bf16.msra.mxu2 %v471_v8 }
  0x25   :  { %253 = vmatpush.bf16.msra.mxu1 %v479_v15  ;;  %498 = vmatpush.bf16.msra.mxu3 %v479_v15 }
  0x28   :  { %161 = vmatpush.bf16.msra.mxu0 %v470_v9  ;;  %491 = vmatpush.bf16.msra.mxu2 %v470_v9 }
  0x29   :  { %254 = vmatpush.bf16.msra.mxu1 %v478_v16  ;;  %499 = vmatpush.bf16.msra.mxu3 %v478_v16 }
  0x2c   :  { %162 = vmatpush.bf16.msra.mxu0 %v469_v10  ;;  %492 = vmatpush.bf16.msra.mxu2 %v469_v10 }
  0x2d   :  { %255 = vmatpush.bf16.msra.mxu1 %v477_v17  ;;  %500 = vmatpush.bf16.msra.mxu3 %v477_v17 }
  0x2f   :  { %163 = vmatmul.bf16.vlgmr.msra.gmra.mxu0 %v467_v11  ;;  %168 = vmatmul.bf16.vlgmr.msra.gmra.mxu2 %v468_v12 }
  0x70   :  { %v320_v59 = vpop.permute.xlu2 %319 }
  0x71   :  { %vm330_vm1 = vcmp.eq.s32.totalorder %v707_v37, %v320_v59 }
  0x72   :  { %v463_v2 = vsel %vm330_vm1, 1.0, %v650_v1 }
  0x78   :  { %v323_v10 = vpop.permute.xlu2 %322 }
  0x79   :  { %vm331_vm2 = vcmp.eq.s32.totalorder %v707_v37, %v323_v10 }
  0x7a   :  { %v464_v12 = vsel %vm331_vm2, 1.0, %v650_v1 }
  0xac   :  { %v164_v20 = vpop.f32.mrf.mxu0 }
  0xad   :  { %v165_v23 = vadd.f32 %v515_v22, %v164_v20 }
  0xaf   :  { %517 = vtanh.f32 %v165_v23 }
  0xb2   :  { %v169_v24 = vpop.f32.mrf.mxu2 }
  0xb3   :  { %v170_v27 = vadd.f32 %v515_v22, %v169_v24 }
  0xb4   :  { %v166_v25 = vpop.f32.mrf.mxu0 }
  0xb5   :  { %v167_v26 = vadd.f32 %v515_v22, %v166_v25  ;;  %v518_v30 = vpop.eup %517 }
  0xb7   :  { %519 = vtanh.f32 %v167_v26 }
  0xb8   :  { %521 = vtanh.f32 %v170_v27 }
  0xba   :  { %v171_v28 = vpop.f32.mrf.mxu2 }
  0xbb   :  { %v172_v29 = vadd.f32 %v515_v22, %v171_v28 }
  0xbd   :  { %v520_v31 = vpop.eup %519  ;;  %523 = vtanh.f32 %v172_v29 }
  0xbe   :  { %v178_v32 = vpack.c.bf16 %v520_v31, %v518_v30  ;;  %v522_v33 = vpop.eup %521 }
  0xc0   :  { %256 = vmatmul.bf16.vlgmr.msra.gmra.mxu1 %v178_v32 }
  0xc3   :  { %v524_v34 = vpop.eup %523 }
  0xc4   :  { %v179_v35 = vpack.c.bf16 %v524_v34, %v522_v33 }
  0xc6   :  { %261 = vmatmul.bf16.vlgmr.msra.gmra.mxu3 %v179_v35 }
 0x13d   :  { %v257_v39 = vpop.f32.mrf.mxu1 }
 0x13e   :  { %v258_v40 = vadd.f32 %v516_v38, %v257_v39 }
 0x140   :  { %v715_v41 = vsel %vm269_vm0, %v258_v40, 0.0  ;;  %v270_v42 = vsel %vm269_vm0, %v258_v40, -inf  ;;  %v342_v4 = vmul.f32 %v463_v2, %v258_v40 }
 0x141   :  { %274 = vmax.xlane.f32.xlu0 %v270_v42 }
 0x145   :  { %v259_v43 = vpop.f32.mrf.mxu1 }
 0x146   :  { %v260_v44 = vadd.f32 %v516_v38, %v259_v43 }
 0x148   :  { %v721_v45 = vsel %vm269_vm0, %v260_v44, 0.0  ;;  %v271_v46 = vsel %vm269_vm0, %v260_v44, -inf  ;;  %v343_v14 = vmul.f32 %v464_v12, %v260_v44 }
 0x149   :  { %v262_v47 = vpop.f32.mrf.mxu3  ;;  %276 = vmax.xlane.f32.xlu0 %v271_v46 }
 0x14a   :  { %v725_v48 = vadd.f32 %v516_v38, %v262_v47 }
 0x14c   :  { %v272_v49 = vsel %vm269_vm0, %v725_v48, -inf  ;;  %v360_v47 = vsel %vm269_vm0, %v725_v48, 0.0 }
 0x14d   :  { %278 = vmax.xlane.f32.xlu1 %v272_v49 }
 0x151   :  { %v264_v50 = vpop.f32.mrf.mxu3 }
 0x152   :  { %v730_v51 = vadd.f32 %v516_v38, %v264_v50 }
 0x154   :  { %v273_v52 = vsel %vm269_vm0, %v730_v51, -inf }
 0x155   :  { %280 = vmax.xlane.f32.xlu1 %v273_v52 }
 0x15d   :  { %325 = vperm.xlu0 %513, %v316_v53  }
 0x16e   :  { %328 = vperm.xlu1 %514, %v317_v54  }
 0x1b4   :  { %v275_v55 = vpop.xlane.xlu0 %274 }
 0x1b5   :  { %v282_v56 = vsub.f32 %v270_v42, %v275_v55 }
 0x1b7   :  { %v286_v57 = vmul.f32 1.442695, %v282_v56 }
 0x1b9   :  { %525 = vpow2.f32 %v286_v57 }
 0x1bc   :  { %v277_v58 = vpop.xlane.xlu0 %276 }
 0x1bd   :  { %v283_v60 = vsub.f32 %v271_v46, %v277_v58 }
 0x1bf   :  { %v526_v61 = vpop.eup %525  ;;  %v288_v62 = vmul.f32 1.442695, %v283_v60 }
 0x1c0   :  { %v279_v63 = vpop.xlane.xlu1 %278  ;;  %294 = vadd.xlane.f32.xlu2 %v526_v61 }
 0x1c1   :  { %527 = vpow2.f32 %v288_v62  ;;  %v284_v0 = vsub.f32 %v272_v49, %v279_v63 }
 0x1c3   :  { %v290_v3 = vmul.f32 1.442695, %v284_v0 }
 0x1c5   :  { %529 = vpow2.f32 %v290_v3 }
 0x1c7   :  { %v528_v5 = vpop.eup %527 }
 0x1c8   :  { %v281_v6 = vpop.xlane.xlu1 %280  ;;  %346 = vadd.xlane.f32.xlu2 %v342_v4  ;;  %296 = vadd.xlane.f32.xlu1 %v528_v5 }
 0x1c9   :  { %v285_v7 = vsub.f32 %v273_v52, %v281_v6 }
 0x1cb   :  { %v530_v8 = vpop.eup %529  ;;  %v292_v9 = vmul.f32 1.442695, %v285_v7 }
 0x1cc   :  { %298 = vadd.xlane.f32.xlu0 %v530_v8 }
 0x1cd   :  { %531 = vpow2.f32 %v292_v9 }
 0x1cf   :  { %v326_v13 = vpop.permute.xlu0 %325 }
 0x1d0   :  { %vm332_vm3 = vcmp.eq.s32.totalorder %v707_v37, %v326_v13 }
 0x1d1   :  { %v465_v15 = vsel %vm332_vm3, 1.0, %v650_v1 }
 0x1d2   :  { %v344_v18 = vmul.f32 %v465_v15, %v725_v48 }
 0x1d3   :  { %v532_v11 = vpop.eup %531 }
 0x1d4   :  { %300 = vadd.xlane.f32.xlu2 %v532_v11 }
 0x1dc   :  { %348 = vadd.xlane.f32.xlu2 %v343_v14 }
 0x1e0   :  { %v329_v16 = vpop.permute.xlu1 %328 }
 0x1e1   :  { %vm333_vm4 = vcmp.eq.s32.totalorder %v707_v37, %v329_v16 }
 0x1e2   :  { %v466_v17 = vsel %vm333_vm4, 1.0, %v650_v1 }
 0x1e3   :  { %v345_v19 = vmul.f32 %v466_v17, %v730_v51 }
 0x1e4   :  { %350 = vadd.xlane.f32.xlu2 %v344_v18 }
 0x1e5   :  { %352 = vadd.xlane.f32.xlu1 %v345_v19 }
 0x233   :  { %v295_v20 = vpop.xlane.xlu2 %294 }
 0x234   :  { %533 = vlog2.f32 %v295_v20 }
 0x23a   :  { %v534_v21 = vpop.eup %533 }
 0x23b   :  { %v303_v22 = vmul.f32 0.6931472, %v534_v21  ;;  %v347_v24 = vpop.xlane.xlu2 %346  ;;  %v297_v25 = vpop.xlane.xlu1 %296 }
 0x23c   :  { %535 = vlog2.f32 %v297_v25 }
 0x23d   :  { %v310_v23 = vadd.f32 %v303_v22, %v275_v55 }
 0x23f   :  { %v354_v26 = vsub.f32 %v310_v23, %v347_v24  ;;  %v299_v28 = vpop.xlane.xlu0 %298 }
 0x240   :  { %537 = vlog2.f32 %v299_v28 }
 0x241   :  { %v363_v27 = vsel %vm362_vm5, %v354_v26, %v715_v41 }
 0x242   :  { %367 = vst [vmem:[#allocation8] sm:$0xff] %v363_v27  ;;  %v536_v29 = vpop.eup %535 }
 0x243   :  { %v305_v31 = vmul.f32 0.6931472, %v536_v29 }
 0x245   :  { %v311_v32 = vadd.f32 %v305_v31, %v277_v58 }
 0x246   :  { %v538_v33 = vpop.eup %537 }
 0x247   :  { %v301_v30 = vpop.xlane.xlu2 %300  ;;  %v307_v38 = vmul.f32 0.6931472, %v538_v33 }
 0x248   :  { %539 = vlog2.f32 %v301_v30 }
 0x249   :  { %v312_v41 = vadd.f32 %v307_v38, %v279_v63 }
 0x24e   :  { %v540_v35 = vpop.eup %539 }
 0x24f   :  { %v349_v34 = vpop.xlane.xlu2 %348  ;;  %v309_v40 = vmul.f32 0.6931472, %v540_v35 }
 0x250   :  { %v355_v36 = vsub.f32 %v311_v32, %v349_v34 }
 0x251   :  { %v313_v43 = vadd.f32 %v309_v40, %v281_v6 }
 0x252   :  { %v364_v39 = vsel %vm362_vm5, %v355_v36, %v721_v45  ;;  %v361_v45 = vsel %vm269_vm0, %v730_v51, 0.0 }
 0x253   :  { %368 = vst [vmem:[#allocation8 + $0x8] sm:$0xff] %v364_v39 }
 0x257   :  { %v351_v42 = vpop.xlane.xlu2 %350 }
 0x258   :  { %v356_v44 = vsub.f32 %v312_v41, %v351_v42  ;;  %v353_v46 = vpop.xlane.xlu1 %352 }
 0x259   :  { %v357_v49 = vsub.f32 %v313_v43, %v353_v46 }
 0x25a   :  { %v365_v50 = vsel %vm362_vm5, %v356_v44, %v360_v47 }
 0x25b   :  { %369 = vst [vmem:[#allocation8 + $0x10] sm:$0xff] %v365_v50  ;;  %v366_v52 = vsel %vm362_vm5, %v357_v49, %v361_v45 }
 0x25c   :  { %370 = vst [vmem:[#allocation8 + $0x18] sm:$0xff] %v366_v52 }
 0x25d   :  { %383 = dma.vmem_to_hbm [thread:$0]  %s376_s22, 512, %s378_s25, [#allocation4], %s652_s6, %s652_s6, %s653_s26  }
 0x25e   :  { %641 = dma.done.wait [#allocation4], 512  }
 0x25f   :  { %642 = vsyncadd [#allocation4], 4294966784 }
 0x260   :  { %388 = vsyncpa [#allocation3], 1 }
 0x261   :  { %389 = vsyncpa [#allocation6], 1 }
 0x262   :  { %390 = vsyncpa [#allocation4], 1 }

</bundles_post_ra>
